<compile_context>
chip_gen: v5e
topology: v5e:2x2
jax: 0.10.0
libtpu: 0.0.40
codegen_flags: <defaults>
</compile_context>

<pallas_src>
import functools

import jax
import jax.numpy as jnp
from jax.experimental import pallas as pl
from jax.experimental.pallas import tpu as pltpu


_LANE = 128
_SUBLANE = 8
_MAX_BATCH_TILE = 4096                  # cap on rows per grid step
_VMEM_BUDGET_BYTES = 40 * 1024 * 1024   # conservative pipeline budget (v7x: 64 MiB phys)
_VMEM_LIMIT_BYTES = 48 * 1024 * 1024    # scoped-VMEM limit handed to Mosaic


def _round_up(n, m):
    return ((n + m - 1) // m) * m


def _round_down(n, m):
    return (n // m) * m


def _choose_batch_tile(batch, in_f, hid_p, emb, act_itemsize, w_itemsize):
    """VMEM-budget-aware batch tile; guarantees >=2 grid steps when possible."""
    # Sublane granularity grows for packed (sub-32-bit) activation dtypes.
    sub = _SUBLANE * max(1, 4 // act_itemsize)
    # Resident weights/biases are still double-buffered by the pipeline.
    weight_bytes = 2 * (in_f * hid_p + hid_p + hid_p * emb + emb) * w_itemsize
    # Per batch row: 2x double-buffered inputs + 2x double-buffered outputs in
    # the activation dtype, plus f32 intermediates (hidden + accumulators).
    per_row = (2 * 2 * (in_f + emb)) * act_itemsize + (hid_p + 2 * emb) * 4
    avail = max(_VMEM_BUDGET_BYTES - weight_bytes, per_row * sub)
    tb = min(avail // per_row, _MAX_BATCH_TILE)
    # Keep at least two grid steps so v7x can shard the batch axis across its
    # two TensorCores (no cost on single-TC v5e/v6e).
    if batch > 2 * sub:
        tb = min(tb, -(-batch // 2))            # ceil(batch / 2)
    tb = max(_round_down(tb, sub), sub)
    return batch if tb >= batch else tb


def _mlp_kernel(x1_ref, x2_ref, w1_ref, b1_ref, w2_ref, b2_ref, o1_ref, o2_ref):
    w1 = w1_ref[...]
    b1 = b1_ref[...]          # (1, hid_p) -> broadcasts over the batch tile
    w2 = w2_ref[...]
    b2 = b2_ref[...]          # (1, emb)

    def branch(x):
        # layer1: Linear + ReLU.  MXU matmul accumulates in f32; the bias add
        # and ReLU are VPU filler under the DMA/MXU critical path.
        h = jnp.dot(x, w1, preferred_element_type=jnp.float32)
        h = jnp.maximum(h + b1, 0.0)
        # layer2: Linear (no activation).
        out = jnp.dot(h.astype(w2.dtype), w2, preferred_element_type=jnp.float32)
        return out + b2

    o1_ref[...] = branch(x1_ref[...]).astype(o1_ref.dtype)
    o2_ref[...] = branch(x2_ref[...]).astype(o2_ref.dtype)


@functools.partial(jax.jit, static_argnames=("block_batch",))
def siamese_forward(input1, input2, params, block_batch=None):
    """Equivalent of SiameseNetwork.forward: returns (output1, output2)."""
    w1, b1, w2, b2 = params
    in_f, hid = w1.shape
    emb = w2.shape[1]
    hid_p = _round_up(hid, _LANE)

    # Zero-pad only the hidden width (numerically exact; see header).  The
    # embedding width stays unpadded so output stores write exactly emb lanes.
    # TODO(synk): for large hid, pre-pad the params once at init instead of
    # per forward call.
    w1p = jnp.pad(w1, ((0, 0), (0, hid_p - hid)))
    b1p = jnp.pad(b1, ((0, 0), (0, hid_p - hid)))
    w2p = jnp.pad(w2, ((0, hid_p - hid), (0, 0)))

    batch = input1.shape[0]
    act_itemsize = jnp.dtype(input1.dtype).itemsize
    w_itemsize = jnp.dtype(w1.dtype).itemsize
    if block_batch is None:
        tb = _choose_batch_tile(batch, in_f, hid_p, emb, act_itemsize, w_itemsize)
    else:
        # Clamp caller-provided tiles to a legal sublane multiple.
        tb = batch if block_batch >= batch else max(
            _round_down(block_batch, _SUBLANE), _SUBLANE)
    grid = (pl.cdiv(batch, tb),)

    def resident(shape):
        # Weights/biases: same block every grid step -> stay VMEM-resident.
        return pl.BlockSpec(shape, lambda i: (0, 0))

    out_struct = jax.ShapeDtypeStruct((batch, emb), input1.dtype)

    out1, out2 = pl.pallas_call(
        _mlp_kernel,
        out_shape=(out_struct, out_struct),
        grid=grid,
        in_specs=[
            pl.BlockSpec((tb, in_f), lambda i: (i, 0)),   # input1 tile
            pl.BlockSpec((tb, in_f), lambda i: (i, 0)),   # input2 tile
            resident((in_f, hid_p)),                      # W1 (hidden-padded)
            resident((1, hid_p)),                         # b1 (hidden-padded)
            resident((hid_p, emb)),                       # W2 (hidden-padded rows)
            resident((1, emb)),                           # b2
        ],
        out_specs=(
            pl.BlockSpec((tb, emb), lambda i: (i, 0)),    # output1 tile (true emb)
            pl.BlockSpec((tb, emb), lambda i: (i, 0)),    # output2 tile (true emb)
        ),
        compiler_params=pltpu.CompilerParams(
            dimension_semantics=("parallel",),            # shard batch over TCs
            vmem_limit_bytes=_VMEM_LIMIT_BYTES,
        ),
    )(input1, input2, w1p, b1p, w2p, b2)

    return out1, out2


def init_params(key, input_layer_size, hidden_layer_size, embedding_layer_size,
                dtype=jnp.float32):
    """Deterministic synthetic parameters (same shapes as the nn.Module)."""
    k1, k2, k3, k4 = jax.random.split(key, 4)
    lim1 = 1.0 / (input_layer_size ** 0.5)
    lim2 = 1.0 / (hidden_layer_size ** 0.5)
    w1 = jax.random.uniform(k1, (input_layer_size, hidden_layer_size),
                            dtype, -lim1, lim1)
    b1 = jax.random.uniform(k2, (1, hidden_layer_size), dtype, -lim1, lim1)
    w2 = jax.random.uniform(k3, (hidden_layer_size, embedding_layer_size),
                            dtype, -lim2, lim2)
    b2 = jax.random.uniform(k4, (1, embedding_layer_size), dtype, -lim2, lim2)
    return w1, b1, w2, b2


if __name__ == "__main__":
    key = jax.random.PRNGKey(0)
    input_layer_size = 64
    hidden_layer_size = 32
    embedding_layer_size = 16
    batch = 64

    kp, kx1, kx2 = jax.random.split(key, 3)
    params = init_params(kp, input_layer_size, hidden_layer_size,
                         embedding_layer_size)
    input1 = jax.random.normal(kx1, (batch, input_layer_size), jnp.float32)
    input2 = jax.random.normal(kx2, (batch, input_layer_size), jnp.float32)

    # Pure-JAX reference.
    w1, b1, w2, b2 = params
    ref1 = jnp.maximum(input1 @ w1 + b1, 0.0) @ w2 + b2
    ref2 = jnp.maximum(input2 @ w1 + b1, 0.0) @ w2 + b2

    # (1) Auto tile: batch=64 -> 2 grid steps of 32 rows (one per TC on v7x).
    out1, out2 = siamese_forward(input1, input2, params)
    jax.block_until_ready((out1, out2))
    assert out1.shape == (batch, embedding_layer_size)
    assert out2.shape == (batch, embedding_layer_size)
    assert jnp.allclose(out1, ref1, atol=1e-5, rtol=1e-5)
    assert jnp.allclose(out2, ref2, atol=1e-5, rtol=1e-5)

    # (2) Forced small tile: exercises a 4-step pipelined grid.
    out1b, out2b = siamese_forward(input1, input2, params, block_batch=16)
    jax.block_until_ready((out1b, out2b))
    assert jnp.allclose(out1b, ref1, atol=1e-5, rtol=1e-5)
    assert jnp.allclose(out2b, ref2, atol=1e-5, rtol=1e-5)

    # (3) bf16 storage path (f32 accumulation inside the kernel): halves HBM
    #     traffic on this memory-bound kernel; compare vs f32 reference with a
    #     bf16-appropriate tolerance.
    params_bf16 = jax.tree_util.tree_map(lambda p: p.astype(jnp.bfloat16), params)
    o1h, o2h = siamese_forward(input1.astype(jnp.bfloat16),
                               input2.astype(jnp.bfloat16), params_bf16)
    jax.block_until_ready((o1h, o2h))
    assert o1h.dtype == jnp.bfloat16 and o2h.dtype == jnp.bfloat16
    assert jnp.allclose(o1h.astype(jnp.float32), ref1, atol=5e-2, rtol=5e-2)
    assert jnp.allclose(o2h.astype(jnp.float32), ref2, atol=5e-2, rtol=5e-2)

    print("KERNEL_OK")
</pallas_src>

<mosaic_0001>
module attributes {stable_mosaic.version = 11 : i64} {
  func.func @_mlp_kernel(%arg0: i32, %arg1: memref<32x64xf32, #tpu.memory_space<vmem>>, %arg2: memref<32x64xf32, #tpu.memory_space<vmem>>, %arg3: memref<64x128xf32, #tpu.memory_space<vmem>>, %arg4: memref<1x128xf32, #tpu.memory_space<vmem>>, %arg5: memref<128x16xf32, #tpu.memory_space<vmem>>, %arg6: memref<1x16xf32, #tpu.memory_space<vmem>>, %arg7: memref<32x16xf32, #tpu.memory_space<vmem>>, %arg8: memref<32x16xf32, #tpu.memory_space<vmem>>) attributes {dimension_semantics = [#tpu.dimension_semantics<parallel>], iteration_bounds = array<i64: 2>, scalar_prefetch = 0 : i64, scratch_operands = 0 : i64, tpu.core_type = #tpu.core_type<tc>, window_params = [{transform_indices = @transform_0, window_bounds = array<i64: 32, 64>}, {transform_indices = @transform_1, window_bounds = array<i64: 32, 64>}, {pipeline_mode = #tpu.pipeline_mode<synchronous>, transform_indices = @transform_2, window_bounds = array<i64: 64, 128>}, {pipeline_mode = #tpu.pipeline_mode<synchronous>, transform_indices = @transform_3, window_bounds = array<i64: 1, 128>}, {pipeline_mode = #tpu.pipeline_mode<synchronous>, transform_indices = @transform_4, window_bounds = array<i64: 128, 16>}, {pipeline_mode = #tpu.pipeline_mode<synchronous>, transform_indices = @transform_5, window_bounds = array<i64: 1, 16>}, {transform_indices = @transform_6, window_bounds = array<i64: 32, 16>}, {transform_indices = @transform_7, window_bounds = array<i64: 32, 16>}]} {
    %c0 = arith.constant 0 : index
    %c0_0 = arith.constant 0 : index
    %0 = vector.load %arg3[%c0, %c0_0] : memref<64x128xf32, #tpu.memory_space<vmem>>, vector<64x128xf32>
    %c0_1 = arith.constant 0 : index
    %c0_2 = arith.constant 0 : index
    %1 = vector.load %arg4[%c0_1, %c0_2] : memref<1x128xf32, #tpu.memory_space<vmem>>, vector<1x128xf32>
    %c0_3 = arith.constant 0 : index
    %c0_4 = arith.constant 0 : index
    %2 = vector.load %arg5[%c0_3, %c0_4] : memref<128x16xf32, #tpu.memory_space<vmem>>, vector<128x16xf32>
    %c0_5 = arith.constant 0 : index
    %c0_6 = arith.constant 0 : index
    %3 = vector.load %arg6[%c0_5, %c0_6] : memref<1x16xf32, #tpu.memory_space<vmem>>, vector<1x16xf32>
    %c0_7 = arith.constant 0 : index
    %c0_8 = arith.constant 0 : index
    %4 = vector.load %arg1[%c0_7, %c0_8] : memref<32x64xf32, #tpu.memory_space<vmem>>, vector<32x64xf32>
    %cst = arith.constant dense<0.000000e+00> : vector<32x128xf32>
    %5 = tpu.matmul %4, %0, %cst {dimension_numbers = #tpu.dot_dimension_numbers<[1], [0], [0], [1], [0, 0, 1, 1], [], []>} : vector<32x64xf32>, vector<64x128xf32>, vector<32x128xf32> -> vector<32x128xf32>
    %6 = vector.broadcast %1 : vector<1x128xf32> to vector<32x128xf32>
    %7 = arith.addf %5, %6 : vector<32x128xf32>
    %cst_9 = arith.constant 0.000000e+00 : f32
    %8 = vector.broadcast %cst_9 : f32 to vector<32x128xf32>
    %9 = arith.maximumf %7, %8 : vector<32x128xf32>
    %cst_10 = arith.constant dense<0.000000e+00> : vector<32x16xf32>
    %10 = tpu.matmul %9, %2, %cst_10 {dimension_numbers = #tpu.dot_dimension_numbers<[1], [0], [0], [1], [0, 0, 1, 1], [], []>} : vector<32x128xf32>, vector<128x16xf32>, vector<32x16xf32> -> vector<32x16xf32>
    %11 = vector.broadcast %3 : vector<1x16xf32> to vector<32x16xf32>
    %12 = arith.addf %10, %11 : vector<32x16xf32>
    %c0_11 = arith.constant 0 : index
    %c0_12 = arith.constant 0 : index
    %13 = vector.load %arg7[%c0_11, %c0_12] : memref<32x16xf32, #tpu.memory_space<vmem>>, vector<32x16xf32>
    tpu.vector_store %arg7[%c0_11, %c0_12], %12 {strides = array<i32>} : memref<32x16xf32, #tpu.memory_space<vmem>>, vector<32x16xf32>,
    %c0_13 = arith.constant 0 : index
    %c0_14 = arith.constant 0 : index
    %14 = vector.load %arg2[%c0_13, %c0_14] : memref<32x64xf32, #tpu.memory_space<vmem>>, vector<32x64xf32>
    %cst_15 = arith.constant dense<0.000000e+00> : vector<32x128xf32>
    %15 = tpu.matmul %14, %0, %cst_15 {dimension_numbers = #tpu.dot_dimension_numbers<[1], [0], [0], [1], [0, 0, 1, 1], [], []>} : vector<32x64xf32>, vector<64x128xf32>, vector<32x128xf32> -> vector<32x128xf32>
    %16 = vector.broadcast %1 : vector<1x128xf32> to vector<32x128xf32>
    %17 = arith.addf %15, %16 : vector<32x128xf32>
    %cst_16 = arith.constant 0.000000e+00 : f32
    %18 = vector.broadcast %cst_16 : f32 to vector<32x128xf32>
    %19 = arith.maximumf %17, %18 : vector<32x128xf32>
    %cst_17 = arith.constant dense<0.000000e+00> : vector<32x16xf32>
    %20 = tpu.matmul %19, %2, %cst_17 {dimension_numbers = #tpu.dot_dimension_numbers<[1], [0], [0], [1], [0, 0, 1, 1], [], []>} : vector<32x128xf32>, vector<128x16xf32>, vector<32x16xf32> -> vector<32x16xf32>
    %21 = vector.broadcast %3 : vector<1x16xf32> to vector<32x16xf32>
    %22 = arith.addf %20, %21 : vector<32x16xf32>
    %c0_18 = arith.constant 0 : index
    %c0_19 = arith.constant 0 : index
    %23 = vector.load %arg8[%c0_18, %c0_19] : memref<32x16xf32, #tpu.memory_space<vmem>>, vector<32x16xf32>
    tpu.vector_store %arg8[%c0_18, %c0_19], %22 {strides = array<i32>} : memref<32x16xf32, #tpu.memory_space<vmem>>, vector<32x16xf32>,
    return
  }
  func.func @transform_0(%arg0: i32) -> (i32, i32) {
    %c0_i32 = arith.constant 0 : i32
    %c0_i32_0 = arith.constant 0 : i32
    return %arg0, %c0_i32 : i32, i32
  }
  func.func @transform_1(%arg0: i32) -> (i32, i32) {
    %c0_i32 = arith.constant 0 : i32
    %c0_i32_0 = arith.constant 0 : i32
    return %arg0, %c0_i32 : i32, i32
  }
  func.func @transform_2(%arg0: i32) -> (i32, i32) {
    %c0_i32 = arith.constant 0 : i32
    %c0_i32_0 = arith.constant 0 : i32
    %c0_i32_1 = arith.constant 0 : i32
    return %c0_i32, %c0_i32_0 : i32, i32
  }
  func.func @transform_3(%arg0: i32) -> (i32, i32) {
    %c0_i32 = arith.constant 0 : i32
    %c0_i32_0 = arith.constant 0 : i32
    %c0_i32_1 = arith.constant 0 : i32
    return %c0_i32, %c0_i32_0 : i32, i32
  }
  func.func @transform_4(%arg0: i32) -> (i32, i32) {
    %c0_i32 = arith.constant 0 : i32
    %c0_i32_0 = arith.constant 0 : i32
    %c0_i32_1 = arith.constant 0 : i32
    return %c0_i32, %c0_i32_0 : i32, i32
  }
  func.func @transform_5(%arg0: i32) -> (i32, i32) {
    %c0_i32 = arith.constant 0 : i32
    %c0_i32_0 = arith.constant 0 : i32
    %c0_i32_1 = arith.constant 0 : i32
    return %c0_i32, %c0_i32_0 : i32, i32
  }
  func.func @transform_6(%arg0: i32) -> (i32, i32) {
    %c0_i32 = arith.constant 0 : i32
    %c0_i32_0 = arith.constant 0 : i32
    return %arg0, %c0_i32 : i32, i32
  }
  func.func @transform_7(%arg0: i32) -> (i32, i32) {
    %c0_i32 = arith.constant 0 : i32
    %c0_i32_0 = arith.constant 0 : i32
    return %arg0, %c0_i32 : i32, i32
  }
}

</mosaic_0001>

<bundles_post_ra>
// kernel: siamese_forward.1
= control target key start
LH: loop header
LB: loop body
LE: loop exit
PB: predicated region body
PF: predicated region fallthrough
CT: control target
= control target key end

     0   :  { %s731_s24 = smov 0   ;;  %s866_s0 = inlined_call_operand.vmem [shape: f32[64,64], index: 0, kind: input, shape index: {}]   ;;  %s867_s1 = inlined_call_operand.vmem [shape: f32[64,64], index: 1, kind: input, shape index: {}]   ;;  %s868_s2 = inlined_call_operand.vmem [shape: f32[64,128], index: 2, kind: input, shape index: {}]   ;;  %s869_s3 = inlined_call_operand.vmem [shape: f32[1,128], index: 3, kind: input, shape index: {}]   ;;  %s870_s4 = inlined_call_operand.vmem [shape: f32[128,16], index: 4, kind: input, shape index: {}]   ;;  %s871_s5 = inlined_call_operand.vmem [shape: f32[1,16], index: 5, kind: input, shape index: {}]   ;;  %s872_s6 = inlined_call_operand.vmem [shape: f32[64,16], index: 6, kind: output, shape index: {0}]   ;;  %s873_s7 = inlined_call_operand.vmem [shape: f32[64,16], index: 7, kind: output, shape index: {1}]  }
   0x1 LB: > { %s618_s25 = sadd.s32 4294967295, %s689_s24   ;;  %p622_p0 = scmp.ge.s32.totalorder %s689_s24, 1  ;;  %s689_s24 = sphi %s731_s24, %s18_s24  }
   0x2   : > { %p252_p1 = scmp.lt.s32.totalorder %s689_s24, 3 }
   0x4   : > { %p253_p2 = pnand %p622_p0, %p252_p1 }
   0x5   : > { %s623_s30 = sshll.u32 (!%p253_p2), %s618_s25, 2 }
   0x6   : > { %256 = sbr.rel (%p253_p2) target bundleno = 322 (0x142), region = 44  ;;  %p295_p3 = scmp.lt.s32.totalorder (!%p253_p2), %s623_s30, 7 }
   0xb   : > { %v325_v0 = vld [vmem:[%s868_s2 + $0x38] sm:$0xff]  ;;  %v324_v1 = vld [vmem:[%s868_s2 + $0x30] sm:$0xff]  ;;  %v323_v2 = vld [vmem:[%s868_s2 + $0x28] sm:$0xff]  ;;  %s875_s30 = smov (!%p295_p3, %s623_s30), 7  ;;  %vm351_vm0 = vcmask 523264   ;;  %vm429_vm1 = vcmask 130048  }
   0xc   : > { %458 = vmatpush.msra.mxu2 %v325_v0  ;;  %372 = vmatpush.msra.mxu0 %v325_v0  ;;  %v322_v3 = vld [vmem:[%s868_s2 + $0x20] sm:$0xff]  ;;  %v321_v4 = vld [vmem:[%s868_s2 + $0x18] sm:$0xff]  ;;  %s754_s14 = sshll.u32 %s875_s30, 3  ;;  %v320_v5 = vld [vmem:[%s868_s2 + $0x10] sm:$0xff] }
   0xd   : > { %v342_v6 = vld [vmem:[%s870_s4 + $0x78] sm:$0xff]  ;;  %v319_v7 = vld [vmem:[%s868_s2 + $0x8] sm:$0xff]  ;;  %s769_s23 = scalar_lea.vmem %s867_s1, %s754_s14  ;;  %s775_s27 = scalar_lea.vmem %s866_s0, %s754_s14  ;;  %v341_v8 = vld [vmem:[%s870_s4 + $0x70] sm:$0xff] }
   0xe   : > { %459 = vmatpush.msra.mxu2 %v324_v1  ;;  %373 = vmatpush.msra.mxu0 %v324_v1  ;;  %v318_v9 = vld [vmem:[%s868_s2] sm:$0xff]  ;;  %v340_v12 = vld [vmem:[%s870_s4 + $0x68] sm:$0xff]  ;;  %v338_v14 = vld [vmem:[%s870_s4 + $0x58] sm:$0xff]  ;;  %s310_s25 = scalar_lea.vmem %s872_s6, %s754_s14  ;;  %s316_s29 = scalar_lea.vmem %s873_s7, %s754_s14 }
   0xf   : > { %657 = vmatpush.msra.mxu3 %v342_v6  ;;  %641 = vmatpush.msra.mxu1 %v342_v6  ;;  %v434_v10 = vld [vmem:[%s769_s23] sm:$0xff]  ;;  %v435_v15 = vld [vmem:[%s769_s23 + $0x8] sm:$0xff]  ;;  %v337_v17 = vld [vmem:[%s870_s4 + $0x50] sm:$0xff] }
  0x10   : > { %460 = vmatpush.msra.mxu2 %v323_v2  ;;  %374 = vmatpush.msra.mxu0 %v323_v2  ;;  %v344_v11 = vld [vmem:[%s775_s27] sm:$0xff]  ;;  %v345_v16 = vld [vmem:[%s775_s27 + $0x8] sm:$0xff]  ;;  %v436_v20 = vld [vmem:[%s769_s23 + $0x10] sm:$0xff] }
  0x11   : > { %658 = vmatpush.msra.mxu3 %v341_v8  ;;  %642 = vmatpush.msra.mxu1 %v341_v8  ;;  %v339_v13 = vld [vmem:[%s870_s4 + $0x60] sm:$0xff]  ;;  %v336_v18 = vld [vmem:[%s870_s4 + $0x48] sm:$0xff]  ;;  %v346_v21 = vld [vmem:[%s775_s27 + $0x10] sm:$0xff] }
  0x12   : > { %461 = vmatpush.msra.mxu2 %v322_v3  ;;  %375 = vmatpush.msra.mxu0 %v322_v3  ;;  %v335_v19 = vld [vmem:[%s870_s4 + $0x40] sm:$0xff]  ;;  %v334_v22 = vld [vmem:[%s870_s4 + $0x38] sm:$0xff]  ;;  %v333_v23 = vld [vmem:[%s870_s4 + $0x30] sm:$0xff] }
  0x13   : > { %659 = vmatpush.msra.mxu3 %v340_v12  ;;  %643 = vmatpush.msra.mxu1 %v340_v12  ;;  %v332_v24 = vld [vmem:[%s870_s4 + $0x28] sm:$0xff]  ;;  %v331_v25 = vld [vmem:[%s870_s4 + $0x20] sm:$0xff]  ;;  %v437_v26 = vld [vmem:[%s769_s23 + $0x18] sm:$0xff] }
  0x14   : > { %462 = vmatpush.msra.mxu2 %v321_v4  ;;  %376 = vmatpush.msra.mxu0 %v321_v4  ;;  %v347_v27 = vld [vmem:[%s775_s27 + $0x18] sm:$0xff]  ;;  %v329_v29 = vld [vmem:[%s870_s4 + $0x10] sm:$0xff]  ;;  %v328_v30 = vld [vmem:[%s870_s4 + $0x8] sm:$0xff] }
  0x15   : > { %660 = vmatpush.msra.mxu3 %v339_v13  ;;  %644 = vmatpush.msra.mxu1 %v339_v13  ;;  %v330_v28 = vld [vmem:[%s870_s4 + $0x18] sm:$0xff]  ;;  %v327_v31 = vld [vmem:[%s870_s4] sm:$0xff] }
  0x16   : > { %463 = vmatpush.msra.mxu2 %v320_v5  ;;  %377 = vmatpush.msra.mxu0 %v320_v5  ;;  %v681_v32 = vld [vmem:[%s869_s3] ss:$0 sm:$0xff] }
  0x17   : > { %661 = vmatpush.msra.mxu3 %v338_v14  ;;  %645 = vmatpush.msra.mxu1 %v338_v14  ;;  %v682_v57 = vld [vmem:[%s871_s5] ss:$0 sm:$0xff] }
  0x18   : > { %464 = vmatpush.msra.mxu2 %v319_v7  ;;  %378 = vmatpush.msra.mxu0 %v319_v7 }
  0x19   : > { %662 = vmatpush.msra.mxu3 %v337_v17  ;;  %646 = vmatpush.msra.mxu1 %v337_v17 }
  0x1a   : > { %465 = vmatpush.msra.mxu2 %v318_v9  ;;  %379 = vmatpush.msra.mxu0 %v318_v9 }
  0x1b   : > { %635 = vmatmul.msk.f32.vlgmr.msra.gmra.mxu2 %vm351_vm0, %v434_v10  ;;  %631 = vmatmul.msk.f32.vlgmr.msra.gmra.mxu0 %vm351_vm0, %v344_v11 }
  0x1c   : > { %483 = vmatpush.msrb.mxu2 %v342_v6  ;;  %400 = vmatpush.msrb.mxu0 %v342_v6 }
  0x1d   : > { %663 = vmatpush.msra.mxu3 %v336_v18  ;;  %647 = vmatpush.msra.mxu1 %v336_v18 }
  0x1e   : > { %484 = vmatpush.msrb.mxu2 %v341_v8  ;;  %401 = vmatpush.msrb.mxu0 %v341_v8 }
  0x1f   : > { %664 = vmatpush.msra.mxu3 %v335_v19  ;;  %648 = vmatpush.msra.mxu1 %v335_v19 }
  0x20   : > { %485 = vmatpush.msrb.mxu2 %v340_v12  ;;  %402 = vmatpush.msrb.mxu0 %v340_v12 }
  0x21   : > { %665 = vmatpush.msra.mxu3 %v334_v22  ;;  %649 = vmatpush.msra.mxu1 %v334_v22 }
  0x22   : > { %486 = vmatpush.msrb.mxu2 %v339_v13  ;;  %403 = vmatpush.msrb.mxu0 %v339_v13 }
  0x23   : > { %636 = vmatmul.msk.f32.gmra.mxu2 %vm351_vm0, %v435_v15  ;;  %632 = vmatmul.msk.f32.gmra.mxu0 %vm351_vm0, %v345_v16 }
  0x24   : > { %487 = vmatpush.msrb.mxu2 %v338_v14  ;;  %404 = vmatpush.msrb.mxu0 %v338_v14 }
  0x25   : > { %666 = vmatpush.msra.mxu3 %v333_v23  ;;  %650 = vmatpush.msra.mxu1 %v333_v23 }
  0x26   : > { %488 = vmatpush.msrb.mxu2 %v337_v17  ;;  %405 = vmatpush.msrb.mxu0 %v337_v17 }
  0x27   : > { %667 = vmatpush.msra.mxu3 %v332_v24  ;;  %651 = vmatpush.msra.mxu1 %v332_v24 }
  0x28   : > { %489 = vmatpush.msrb.mxu2 %v336_v18  ;;  %406 = vmatpush.msrb.mxu0 %v336_v18 }
  0x29   : > { %668 = vmatpush.msra.mxu3 %v331_v25  ;;  %652 = vmatpush.msra.mxu1 %v331_v25 }
  0x2a   : > { %490 = vmatpush.msrb.mxu2 %v335_v19  ;;  %407 = vmatpush.msrb.mxu0 %v335_v19 }
  0x2b   : > { %637 = vmatmul.msk.f32.gmra.mxu2 %vm351_vm0, %v436_v20  ;;  %633 = vmatmul.msk.f32.gmra.mxu0 %vm351_vm0, %v346_v21 }
  0x2c   : > { %491 = vmatpush.msrb.mxu2 %v334_v22  ;;  %408 = vmatpush.msrb.mxu0 %v334_v22 }
  0x2d   : > { %669 = vmatpush.msra.mxu3 %v330_v28  ;;  %653 = vmatpush.msra.mxu1 %v330_v28 }
  0x2e   : > { %492 = vmatpush.msrb.mxu2 %v333_v23  ;;  %409 = vmatpush.msrb.mxu0 %v333_v23 }
  0x2f   : > { %670 = vmatpush.msra.mxu3 %v329_v29  ;;  %654 = vmatpush.msra.mxu1 %v329_v29 }
  0x30   : > { %493 = vmatpush.msrb.mxu2 %v332_v24  ;;  %410 = vmatpush.msrb.mxu0 %v332_v24 }
  0x31   : > { %671 = vmatpush.msra.mxu3 %v328_v30  ;;  %655 = vmatpush.msra.mxu1 %v328_v30 }
  0x32   : > { %494 = vmatpush.msrb.mxu2 %v331_v25  ;;  %411 = vmatpush.msrb.mxu0 %v331_v25 }
  0x33   : > { %638 = vmatmul.msk.f32.gmra.mxu2 %vm351_vm0, %v437_v26  ;;  %634 = vmatmul.msk.f32.gmra.mxu0 %vm351_vm0, %v347_v27 }
  0x34   : > { %495 = vmatpush.msrb.mxu2 %v330_v28  ;;  %412 = vmatpush.msrb.mxu0 %v330_v28 }
  0x35   : > { %672 = vmatpush.msra.mxu3 %v327_v31  ;;  %656 = vmatpush.msra.mxu1 %v327_v31 }
  0x36   : > { %496 = vmatpush.msrb.mxu2 %v329_v29  ;;  %413 = vmatpush.msrb.mxu0 %v329_v29 }
  0x38   : > { %497 = vmatpush.msrb.mxu2 %v328_v30  ;;  %414 = vmatpush.msrb.mxu0 %v328_v30 }
  0x3a   : > { %498 = vmatpush.msrb.mxu2 %v327_v31  ;;  %415 = vmatpush.msrb.mxu0 %v327_v31 }
  0x98   : > { %v381_v33 = vpop.f32.mrf.mxu0 }
  0x99   : > { %v382_v34 = vadd.f32 %v681_v32, %v381_v33 }
  0x9b   : > { %v393_v35 = vmax.f32 %v382_v34, 0.0 }
  0x9d   : > { %416 = vmatmul.f32.vlgmr.msrb.gmra.mxu0 %v393_v35 }
  0x9e   : > { %v467_v36 = vpop.f32.mrf.mxu2 }
  0x9f   : > { %v468_v37 = vadd.f32 %v681_v32, %v467_v36 }
  0xa0   : > { %v384_v38 = vpop.f32.mrf.mxu0 }
  0xa1   : > { %v479_v39 = vmax.f32 %v468_v37, 0.0  ;;  %v385_v40 = vadd.f32 %v681_v32, %v384_v38 }
  0xa3   : > { %499 = vmatmul.f32.vlgmr.msrb.gmra.mxu2 %v479_v39  ;;  %v394_v41 = vmax.f32 %v385_v40, 0.0 }
  0xa5   : > { %419 = vmatmul.f32.vlgmr.msra.gmra.mxu1 %v394_v41 }
  0xa6   : > { %v470_v42 = vpop.f32.mrf.mxu2 }
  0xa7   : > { %v471_v43 = vadd.f32 %v681_v32, %v470_v42 }
  0xa8   : > { %v387_v44 = vpop.f32.mrf.mxu0 }
  0xa9   : > { %v480_v45 = vmax.f32 %v471_v43, 0.0  ;;  %v388_v46 = vadd.f32 %v681_v32, %v387_v44 }
  0xab   : > { %502 = vmatmul.f32.vlgmr.msra.gmra.mxu3 %v480_v45  ;;  %v395_v47 = vmax.f32 %v388_v46, 0.0 }
  0xad   : > { %422 = vmatmul.f32.gmra.mxu1 %v395_v47 }
  0xae   : > { %v473_v48 = vpop.f32.mrf.mxu2 }
  0xaf   : > { %v474_v49 = vadd.f32 %v681_v32, %v473_v48 }
  0xb0   : > { %v390_v50 = vpop.f32.mrf.mxu0 }
  0xb1   : > { %v481_v51 = vmax.f32 %v474_v49, 0.0  ;;  %v391_v52 = vadd.f32 %v681_v32, %v390_v50 }
  0xb3   : > { %505 = vmatmul.f32.gmra.mxu3 %v481_v51  ;;  %v396_v53 = vmax.f32 %v391_v52, 0.0 }
  0xb5   : > { %425 = vmatmul.f32.gmra.mxu1 %v396_v53 }
  0xb6   : > { %v476_v54 = vpop.f32.mrf.mxu2 }
  0xb7   : > { %v477_v55 = vadd.f32 %v681_v32, %v476_v54 }
  0xb9   : > { %v482_v56 = vmax.f32 %v477_v55, 0.0 }
  0xbb   : > { %508 = vmatmul.f32.gmra.mxu3 %v482_v56 }
 0x11a   : > { %v417_v58 = vpop.f32.mrf.mxu0 }
 0x11b   : > { %v418_v59 = vadd.f32 %v682_v57, %v417_v58 }
 0x11d   : > { %430 = vst.msk [vmem:[%s310_s25] sm:$0xff] %vm429_vm1, %v418_v59 }
 0x122   : > { %v420_v60 = vpop.f32.mrf.mxu1 }
 0x123   : > { %v421_v61 = vadd.f32 %v682_v57, %v420_v60 }
 0x125   : > { %431 = vst.msk [vmem:[%s310_s25 + $0x8] sm:$0xff] %vm429_vm1, %v421_v61 }
 0x126   : > { %v500_v62 = vpop.f32.mrf.mxu2 }
 0x127   : > { %v501_v63 = vadd.f32 %v682_v57, %v500_v62 }
 0x129   : > { %512 = vst.msk [vmem:[%s316_s29] sm:$0xff] %vm429_vm1, %v501_v63 }
 0x12a   : > { %v423_v0 = vpop.f32.mrf.mxu1 }
 0x12b   : > { %v424_v1 = vadd.f32 %v682_v57, %v423_v0 }
 0x12d   : > { %432 = vst.msk [vmem:[%s310_s25 + $0x10] sm:$0xff] %vm429_vm1, %v424_v1 }
 0x12e   : > { %v503_v2 = vpop.f32.mrf.mxu3 }
 0x12f   : > { %v504_v3 = vadd.f32 %v682_v57, %v503_v2 }
 0x131   : > { %513 = vst.msk [vmem:[%s316_s29 + $0x8] sm:$0xff] %vm429_vm1, %v504_v3 }
 0x132   : > { %v426_v4 = vpop.f32.mrf.mxu1 }
 0x133   : > { %v427_v5 = vadd.f32 %v682_v57, %v426_v4 }
 0x135   : > { %433 = vst.msk [vmem:[%s310_s25 + $0x18] sm:$0xff] %vm429_vm1, %v427_v5 }
 0x136   : > { %v506_v6 = vpop.f32.mrf.mxu3 }
 0x137   : > { %v507_v7 = vadd.f32 %v682_v57, %v506_v6 }
 0x139   : > { %514 = vst.msk [vmem:[%s316_s29 + $0x10] sm:$0xff] %vm429_vm1, %v507_v7 }
 0x13e   : > { %v509_v8 = vpop.f32.mrf.mxu3 }
 0x13f   : > { %v510_v9 = vadd.f32 %v682_v57, %v509_v8 }
 0x141   : > { %515 = vst.msk [vmem:[%s316_s29 + $0x18] sm:$0xff] %vm429_vm1, %v510_v9 }
 0x142 PF: > { %s18_s24 = sadd.s32 1, %s689_s24  }
 0x143   : > { %p15_p4 = scmp.ge.s32.totalorder %s18_s24, 4  }
 0x145   :  { %17 = sbr.rel (!%p15_p4) target bundleno = 1 (0x1), region = 89 }

</bundles_post_ra>
